<compile_context>
chip_gen: v6e
topology: v6e:2x2x1
jax: 0.10.0
libtpu: 0.0.40
codegen_flags: <defaults>
</compile_context>

<pallas_src>
import jax
import jax.numpy as jnp
from jax.experimental import pallas as pl
from jax.experimental.pallas import tpu as pltpu

BN_EPS = 1e-5
LANE = 128
SUBLANE = 8


def _round_up(n, m):
    return ((n + m - 1) // m) * m


def _pad2d(a, rows, cols):
    out = jnp.zeros((rows, cols), a.dtype)
    return out.at[: a.shape[0], : a.shape[1]].set(a)


def batch_net_kernel(x_ref, w1_ref, w2_ref, w3_ref, vec_ref, o_ref):
    """Fused MLP forward: (Linear -> BN(train) -> ReLU) x2 -> Linear.

    x_ref  : (B, in_dim)      f32 (cast to bf16 in-kernel for the MXU)
    w1_ref : (in_dim, H1_p)   bf16, lane-padded
    w2_ref : (H1_p, H2_p)     bf16, lane-padded
    w3_ref : (H2_p, out_dim)  bf16 (output lanes unpadded)
    vec_ref: (8, P_max)       f32 slab; rows = [g1, be1, g2, be2, b3, 0, 0, 0]
    o_ref  : (B, out_dim)     f32
    """
    B = x_ref.shape[0]
    inv_b = jnp.float32(1.0 / B)
    h1_p = w1_ref.shape[1]
    h2_p = w2_ref.shape[1]
    out_dim = o_ref.shape[1]

    def bn_relu(h, g_row, be_row, n):
        # Two-pass batch statistics (mean, then centered second moment): numerically robust,
        # matches torch's training-mode BatchNorm1d.  The preceding Linear bias cancels in
        # (h + b) - mean(h + b), so it is never materialized.
        g = vec_ref[g_row:g_row + 1, :n]
        be = vec_ref[be_row:be_row + 1, :n]
        m = jnp.sum(h, axis=0, keepdims=True) * inv_b
        hc = h - m
        var = jnp.sum(hc * hc, axis=0, keepdims=True) * inv_b     # biased variance
        scale = g * jax.lax.rsqrt(var + BN_EPS)                   # (1, n)
        return jnp.maximum(hc * scale + be, 0.0)                  # FMA + ReLU, f32

    # ---- layer1: Linear -> BN -> ReLU ----
    x_bf16 = x_ref[...].astype(jnp.bfloat16)
    h = jnp.dot(x_bf16, w1_ref[...], preferred_element_type=jnp.float32)
    h = bn_relu(h, 0, 1, h1_p)

    # ---- layer2: Linear -> BN -> ReLU (bf16 into the MXU, f32 accumulate) ----
    h = jnp.dot(h.astype(jnp.bfloat16), w2_ref[...], preferred_element_type=jnp.float32)
    h = bn_relu(h, 2, 3, h2_p)

    # ---- layer3: Linear (bias applied; output stored unpadded) ----
    b3 = vec_ref[4:5, :][:, :out_dim]
    out = jnp.dot(h.astype(jnp.bfloat16), w3_ref[...],
                  preferred_element_type=jnp.float32) + b3
    o_ref[...] = out.astype(o_ref.dtype)


def prepare_params(params):
    """One-time weight preparation: lane-pad hidden dims, cast MXU operands to bf16, and pack
    the per-layer (1, N) vectors into a single (8, P_max) f32 slab (one DMA at run time)."""
    in_dim, h1 = params["w1"].shape
    h2 = params["w2"].shape[1]
    out_dim = params["w3"].shape[1]

    h1_p = _round_up(h1, LANE)
    h2_p = _round_up(h2, LANE)
    p_max = max(h1_p, h2_p, _round_up(out_dim, LANE))

    w1_p = _pad2d(params["w1"], in_dim, h1_p).astype(jnp.bfloat16)
    w2_p = _pad2d(params["w2"], h1_p, h2_p).astype(jnp.bfloat16)
    w3_p = _pad2d(params["w3"], h2_p, out_dim).astype(jnp.bfloat16)

    # Gamma padded with 0 keeps padded features exactly 0 after BN+ReLU.
    # b1/b2 are intentionally not packed: they cancel under train-mode BatchNorm.
    vec = jnp.zeros((SUBLANE, p_max), jnp.float32)
    vec = vec.at[0, :h1].set(params["g1"][0])
    vec = vec.at[1, :h1].set(params["be1"][0])
    vec = vec.at[2, :h2].set(params["g2"][0])
    vec = vec.at[3, :h2].set(params["be2"][0])
    vec = vec.at[4, :out_dim].set(params["b3"][0])

    return {"w1p": w1_p, "w2p": w2_p, "w3p": w3_p, "vec": vec}


@jax.jit
def batch_net_forward(x, w1p, w2p, w3p, vec):
    """x: (B, in_dim) f32.  Prepared weights from prepare_params (cached across calls)."""
    B = x.shape[0]
    out_dim = w3p.shape[1]
    args = (x, w1p, w2p, w3p, vec)

    # Explicit VMEM budget from the actual footprint.  48 MiB cap is safe on v7x (64 MiB
    # physical); v5e/v6e (128 MiB VMEM) could raise this toward ~100 MiB for larger batches.
    arg_bytes = sum(a.size * a.dtype.itemsize for a in args) + 4 * B * out_dim
    act_bytes = 4 * B * (w1p.shape[1] + w2p.shape[1] + out_dim)
    vmem_limit = int(min(max(4 * (arg_bytes + act_bytes), 8 << 20), 48 << 20))

    vmem_spec = pl.BlockSpec(memory_space=pltpu.MemorySpace.VMEM)
    return pl.pallas_call(
        batch_net_kernel,
        out_shape=jax.ShapeDtypeStruct((B, out_dim), jnp.float32),
        in_specs=[vmem_spec] * len(args),
        out_specs=vmem_spec,
        compiler_params=pltpu.CompilerParams(vmem_limit_bytes=vmem_limit),
    )(*args)


def init_params(key, in_dim, n_hidden_1, n_hidden_2, out_dim):
    """Deterministic synthetic init matching torch.nn.Linear / BatchNorm1d shapes."""
    ks = jax.random.split(key, 6)

    def linear(kw, kb, fan_in, fan_out):
        bound = 1.0 / jnp.sqrt(fan_in)
        w = jax.random.uniform(kw, (fan_in, fan_out), jnp.float32, -bound, bound)
        b = jax.random.uniform(kb, (1, fan_out), jnp.float32, -bound, bound)
        return w, b

    w1, b1 = linear(ks[0], ks[1], in_dim, n_hidden_1)
    w2, b2 = linear(ks[2], ks[3], n_hidden_1, n_hidden_2)
    w3, b3 = linear(ks[4], ks[5], n_hidden_2, out_dim)

    return {
        "w1": w1, "b1": b1,
        "g1": jnp.ones((1, n_hidden_1), jnp.float32),    # BatchNorm1d weight
        "be1": jnp.zeros((1, n_hidden_1), jnp.float32),  # BatchNorm1d bias
        "w2": w2, "b2": b2,
        "g2": jnp.ones((1, n_hidden_2), jnp.float32),
        "be2": jnp.zeros((1, n_hidden_2), jnp.float32),
        "w3": w3, "b3": b3,
    }


def reference_forward(x, p, matmul_dtype):
    """Plain-JAX reference (training-mode BN). matmul_dtype controls MXU-operand precision."""
    def mm(a, w):
        return jnp.dot(a.astype(matmul_dtype), w.astype(matmul_dtype),
                       preferred_element_type=jnp.float32)

    def bn_relu(h, g, be):
        m = h.mean(0, keepdims=True)
        v = ((h - m) ** 2).mean(0, keepdims=True)
        return jnp.maximum((h - m) * jax.lax.rsqrt(v + BN_EPS) * g + be, 0.0)

    h = bn_relu(mm(x, p["w1"]) + p["b1"], p["g1"], p["be1"])
    h = bn_relu(mm(h, p["w2"]) + p["b2"], p["g2"], p["be2"])
    return mm(h, p["w3"]) + p["b3"]


if __name__ == "__main__":
    # Small MNIST-like MLP: in_dim=64, hidden1=128, hidden2=64, out_dim=10, batch=8.
    B, IN_DIM, H1, H2, OUT = 8, 64, 128, 64, 10

    key = jax.random.PRNGKey(0)
    kx, kp = jax.random.split(key)
    x = jax.random.normal(kx, (B, IN_DIM), jnp.float32)
    params = init_params(kp, IN_DIM, H1, H2, OUT)
    prepared = prepare_params(params)   # one-time weight prep (cached across calls)

    out = batch_net_forward(x, prepared["w1p"], prepared["w2p"], prepared["w3p"],
                            prepared["vec"])
    out = jax.block_until_ready(out)
    assert out.shape == (B, OUT), out.shape

    # Matched-precision reference (bf16 MXU operands, f32 accumulate) -> tight check.
    ref_bf16 = reference_forward(x, params, jnp.bfloat16)
    assert jnp.allclose(out, ref_bf16, atol=1e-2, rtol=1e-2), "mismatch vs bf16-matched reference"

    # Full-f32 reference -> loose check that forward semantics are preserved.
    ref_f32 = reference_forward(x, params, jnp.float32)
    assert jnp.allclose(out, ref_f32, atol=1e-1, rtol=1e-1), "mismatch vs f32 reference"

    print("KERNEL_OK")
</pallas_src>

<mosaic_0001>
module attributes {stable_mosaic.version = 11 : i64} {
  func.func @batch_net_kernel(%arg0: memref<8x64xf32, #tpu.memory_space<vmem>>, %arg1: memref<64x128xbf16, #tpu.memory_space<vmem>>, %arg2: memref<128x128xbf16, #tpu.memory_space<vmem>>, %arg3: memref<128x10xbf16, #tpu.memory_space<vmem>>, %arg4: memref<8x128xf32, #tpu.memory_space<vmem>>, %arg5: memref<8x10xf32, #tpu.memory_space<vmem>>) attributes {dimension_semantics = [], scalar_prefetch = 0 : i64, scratch_operands = 0 : i64, tpu.core_type = #tpu.core_type<tc>} {
    %c0 = arith.constant 0 : index
    %c0_0 = arith.constant 0 : index
    %0 = vector.load %arg0[%c0, %c0_0] : memref<8x64xf32, #tpu.memory_space<vmem>>, vector<8x64xf32>
    %1 = arith.truncf %0 : vector<8x64xf32> to vector<8x64xbf16>
    %c0_1 = arith.constant 0 : index
    %c0_2 = arith.constant 0 : index
    %2 = vector.load %arg1[%c0_1, %c0_2] : memref<64x128xbf16, #tpu.memory_space<vmem>>, vector<64x128xbf16>
    %cst = arith.constant dense<0.000000e+00> : vector<8x128xf32>
    %3 = tpu.matmul %1, %2, %cst {dimension_numbers = #tpu.dot_dimension_numbers<[1], [0], [0], [1], [0, 0, 1, 1], [], []>} : vector<8x64xbf16>, vector<64x128xbf16>, vector<8x128xf32> -> vector<8x128xf32>
    %c0_3 = arith.constant 0 : index
    %c0_4 = arith.constant 0 : index
    %4 = vector.load %arg4[%c0_3, %c0_4] : memref<8x128xf32, #tpu.memory_space<vmem>>, vector<1x128xf32>
    %c1 = arith.constant 1 : index
    %c0_5 = arith.constant 0 : index
    %5 = vector.load %arg4[%c1, %c0_5] : memref<8x128xf32, #tpu.memory_space<vmem>>, vector<1x128xf32>
    %cst_6 = arith.constant dense<0.000000e+00> : vector<128xf32>
    %6 = vector.multi_reduction <add>, %3, %cst_6 [0] : vector<8x128xf32> to vector<128xf32>
    %7 = vector.shape_cast %6 : vector<128xf32> to vector<1x128xf32>
    %cst_7 = arith.constant 1.250000e-01 : f32
    %8 = vector.broadcast %cst_7 : f32 to vector<1x128xf32>
    %9 = arith.mulf %7, %8 : vector<1x128xf32>
    %10 = vector.broadcast %9 : vector<1x128xf32> to vector<8x128xf32>
    %11 = arith.subf %3, %10 : vector<8x128xf32>
    %12 = arith.mulf %11, %11 : vector<8x128xf32>
    %cst_8 = arith.constant dense<0.000000e+00> : vector<128xf32>
    %13 = vector.multi_reduction <add>, %12, %cst_8 [0] : vector<8x128xf32> to vector<128xf32>
    %14 = vector.shape_cast %13 : vector<128xf32> to vector<1x128xf32>
    %cst_9 = arith.constant 1.250000e-01 : f32
    %15 = vector.broadcast %cst_9 : f32 to vector<1x128xf32>
    %16 = arith.mulf %14, %15 : vector<1x128xf32>
    %cst_10 = arith.constant 9.99999974E-6 : f32
    %17 = vector.broadcast %cst_10 : f32 to vector<1x128xf32>
    %18 = arith.addf %16, %17 : vector<1x128xf32>
    %19 = math.rsqrt %18 : vector<1x128xf32>
    %20 = arith.mulf %4, %19 : vector<1x128xf32>
    %21 = vector.broadcast %20 : vector<1x128xf32> to vector<8x128xf32>
    %22 = arith.mulf %11, %21 : vector<8x128xf32>
    %23 = vector.broadcast %5 : vector<1x128xf32> to vector<8x128xf32>
    %24 = arith.addf %22, %23 : vector<8x128xf32>
    %cst_11 = arith.constant 0.000000e+00 : f32
    %25 = vector.broadcast %cst_11 : f32 to vector<8x128xf32>
    %26 = arith.maximumf %24, %25 : vector<8x128xf32>
    %27 = arith.truncf %26 : vector<8x128xf32> to vector<8x128xbf16>
    %c0_12 = arith.constant 0 : index
    %c0_13 = arith.constant 0 : index
    %28 = vector.load %arg2[%c0_12, %c0_13] : memref<128x128xbf16, #tpu.memory_space<vmem>>, vector<128x128xbf16>
    %cst_14 = arith.constant dense<0.000000e+00> : vector<8x128xf32>
    %29 = tpu.matmul %27, %28, %cst_14 {dimension_numbers = #tpu.dot_dimension_numbers<[1], [0], [0], [1], [0, 0, 1, 1], [], []>} : vector<8x128xbf16>, vector<128x128xbf16>, vector<8x128xf32> -> vector<8x128xf32>
    %c2 = arith.constant 2 : index
    %c0_15 = arith.constant 0 : index
    %30 = vector.load %arg4[%c2, %c0_15] : memref<8x128xf32, #tpu.memory_space<vmem>>, vector<1x128xf32>
    %c3 = arith.constant 3 : index
    %c0_16 = arith.constant 0 : index
    %31 = vector.load %arg4[%c3, %c0_16] : memref<8x128xf32, #tpu.memory_space<vmem>>, vector<1x128xf32>
    %cst_17 = arith.constant dense<0.000000e+00> : vector<128xf32>
    %32 = vector.multi_reduction <add>, %29, %cst_17 [0] : vector<8x128xf32> to vector<128xf32>
    %33 = vector.shape_cast %32 : vector<128xf32> to vector<1x128xf32>
    %cst_18 = arith.constant 1.250000e-01 : f32
    %34 = vector.broadcast %cst_18 : f32 to vector<1x128xf32>
    %35 = arith.mulf %33, %34 : vector<1x128xf32>
    %36 = vector.broadcast %35 : vector<1x128xf32> to vector<8x128xf32>
    %37 = arith.subf %29, %36 : vector<8x128xf32>
    %38 = arith.mulf %37, %37 : vector<8x128xf32>
    %cst_19 = arith.constant dense<0.000000e+00> : vector<128xf32>
    %39 = vector.multi_reduction <add>, %38, %cst_19 [0] : vector<8x128xf32> to vector<128xf32>
    %40 = vector.shape_cast %39 : vector<128xf32> to vector<1x128xf32>
    %cst_20 = arith.constant 1.250000e-01 : f32
    %41 = vector.broadcast %cst_20 : f32 to vector<1x128xf32>
    %42 = arith.mulf %40, %41 : vector<1x128xf32>
    %cst_21 = arith.constant 9.99999974E-6 : f32
    %43 = vector.broadcast %cst_21 : f32 to vector<1x128xf32>
    %44 = arith.addf %42, %43 : vector<1x128xf32>
    %45 = math.rsqrt %44 : vector<1x128xf32>
    %46 = arith.mulf %30, %45 : vector<1x128xf32>
    %47 = vector.broadcast %46 : vector<1x128xf32> to vector<8x128xf32>
    %48 = arith.mulf %37, %47 : vector<8x128xf32>
    %49 = vector.broadcast %31 : vector<1x128xf32> to vector<8x128xf32>
    %50 = arith.addf %48, %49 : vector<8x128xf32>
    %cst_22 = arith.constant 0.000000e+00 : f32
    %51 = vector.broadcast %cst_22 : f32 to vector<8x128xf32>
    %52 = arith.maximumf %50, %51 : vector<8x128xf32>
    %c4 = arith.constant 4 : index
    %c0_23 = arith.constant 0 : index
    %53 = vector.load %arg4[%c4, %c0_23] : memref<8x128xf32, #tpu.memory_space<vmem>>, vector<1x128xf32>
    %54 = vector.extract_strided_slice %53 {offsets = [0, 0], sizes = [1, 10], strides = [1, 1]} : vector<1x128xf32> to vector<1x10xf32>
    %55 = arith.truncf %52 : vector<8x128xf32> to vector<8x128xbf16>
    %c0_24 = arith.constant 0 : index
    %c0_25 = arith.constant 0 : index
    %56 = vector.load %arg3[%c0_24, %c0_25] : memref<128x10xbf16, #tpu.memory_space<vmem>>, vector<128x10xbf16>
    %cst_26 = arith.constant dense<0.000000e+00> : vector<8x10xf32>
    %57 = tpu.matmul %55, %56, %cst_26 {dimension_numbers = #tpu.dot_dimension_numbers<[1], [0], [0], [1], [0, 0, 1, 1], [], []>} : vector<8x128xbf16>, vector<128x10xbf16>, vector<8x10xf32> -> vector<8x10xf32>
    %58 = vector.broadcast %54 : vector<1x10xf32> to vector<8x10xf32>
    %59 = arith.addf %57, %58 : vector<8x10xf32>
    %c0_27 = arith.constant 0 : index
    %c0_28 = arith.constant 0 : index
    %60 = vector.load %arg5[%c0_27, %c0_28] : memref<8x10xf32, #tpu.memory_space<vmem>>, vector<8x10xf32>
    tpu.vector_store %arg5[%c0_27, %c0_28], %59 {strides = array<i32>} : memref<8x10xf32, #tpu.memory_space<vmem>>, vector<8x10xf32>,
    return
  }
}

</mosaic_0001>

<bundles_post_ra>
// kernel: batch_net_forward.1
= control target key start
LH: loop header
LB: loop body
LE: loop exit
PB: predicated region body
PF: predicated region fallthrough
CT: control target
= control target key end

     0   :  { %10 = vsyncpa [#allocation3], 0  ;;  %s742_s0 = inlined_call_operand.vmem [shape: f32[8,64], index: 0, kind: input, shape index: {}]   ;;  %s743_s1 = inlined_call_operand.hbm [shape: bf16[64,128], index: 1, kind: input, shape index: {}]   ;;  %s744_s2 = inlined_call_operand.vmem [shape: bf16[128,128], index: 2, kind: input, shape index: {}]   ;;  %s745_s3 = inlined_call_operand.vmem [shape: bf16[128,10], index: 3, kind: input, shape index: {}]   ;;  %s746_s4 = inlined_call_operand.hbm [shape: f32[8,128], index: 4, kind: input, shape index: {}]   ;;  %s747_s5 = inlined_call_operand.hbm [shape: f32[8,10], index: 5, kind: output, shape index: {}]  }
   0x1   :  { %11 = vsyncpa [#allocation6], 0 }
   0x2   :  { %12 = vsyncpa [#allocation4], 0  ;;  %s619_s18 = smov [#allocation2]  }
   0x3   :  { %s20_s19 = sshll.u32 %s619_s18, 4  ;;  %s21_s19 = int_to_ptr.vmem [resolvable:$true] %s20_s19 }
   0x4   :  { %s561_s20 = scalar_lea.vmem %s21_s19, 512  ;;  %p566_p1 = scmp.lt.s32.totalorder %s21_s19, %s21_s19 }
   0x5   :  { %p562_p0 = scmp.ne.s32.totalorder %s21_s19, %s561_s20  ;;  %p567_p2 = scmp.lt.s32.totalorder %s561_s20, %s561_s20 }
   0x7   :  { %p568_p3 = por %p567_p2, %p566_p1 }
   0x9   :  { %p569_p4 = pnand %p568_p3, %p562_p0 }
   0xb   :  { %572 = shalt.err (!%p569_p4)
}
   0xc   :  { %s620_s21 = smov 64   ;;  %s621_s22 = smov 4  }
   0xd   :  { %26 = dma.hbm_to_vmem [thread:$0]  %s743_s1, 512, %s21_s19, [#allocation3], %s620_s21, %s620_s21, %s621_s22  }
   0xe   :  { %s622_s25 = smov [#allocation5]  }
   0xf   :  { %s37_s26 = sshll.u32 %s622_s25, 4  ;;  %s38_s26 = int_to_ptr.vmem [resolvable:$true] %s37_s26 }
  0x10   :  { %s581_s27 = scalar_lea.vmem %s38_s26, 128  ;;  %p586_p6 = scmp.lt.s32.totalorder %s38_s26, %s38_s26 }
  0x11   :  { %p582_p5 = scmp.ne.s32.totalorder %s38_s26, %s581_s27  ;;  %p587_p7 = scmp.lt.s32.totalorder %s581_s27, %s581_s27 }
  0x13   :  { %p588_p8 = por %p587_p7, %p586_p6 }
  0x15   :  { %p589_p9 = pnand %p588_p8, %p582_p5 }
  0x17   :  { %592 = shalt.err (!%p589_p9)
}
  0x18   :  { %40 = dma.hbm_to_vmem [thread:$0]  %s746_s4, 128, %s38_s26, [#allocation6]  }
  0x19   :  { %613 = dma.done.wait [#allocation3], 512  }
  0x1a   :  { %614 = vsyncadd [#allocation3], 4294966784 }
  0x1b   :  { %615 = dma.done.wait [#allocation6], 128  }
  0x1c   :  { %616 = vsyncadd [#allocation6], 4294967168  ;;  %v623_v0 = vmov 0.0   ;;  %vm624_vm0 = vmmov 0   ;;  %v529_v1 = vld [vmem:[#allocation2 + $0x18] sm:$0xff]   ;;  %v530_v2 = vld [vmem:[#allocation2 + $0x10] sm:$0xff]   ;;  %v147_v36 = vlaneseq }
  0x1d   :  { %470 = vmatprep.subr.bf16.mxu0 %v623_v0  ;;  %478 = vmatprep.mubr.msk.bf16.mxu0 %vm624_vm0, %v623_v0  ;;  %v531_v3 = vld [vmem:[#allocation2 + $0x8] sm:$0xff]   ;;  %vm82_vm1 = vcmask 523264   ;;  %v532_v4 = vld [vmem:[#allocation2] sm:$0xff]   ;;  %v533_v7 = vld [vmem:[%s744_s2 + $0x38] sm:$0xff]   ;;  %vm405_vm2 = vcmask 80896  }
  0x1e   :  { %482 = vmatprep.subr.bf16.mxu1 %v623_v0  ;;  %498 = vmatprep.mubr.msk.bf16.mxu1 %vm624_vm0, %v623_v0  ;;  %v48_v5 = vld [vmem:[%s742_s0] sm:$0xff]  ;;  %v534_v8 = vld [vmem:[%s744_s2 + $0x30] sm:$0xff]   ;;  %v535_v9 = vld [vmem:[%s744_s2 + $0x28] sm:$0xff]   ;;  %v148_v37 = vshrl.u32 %v147_v36, 7 }
  0x1f   :  { %471 = vmatpush3.bf16.msra.mxu0 %v529_v1  ;;  %v49_v6 = vpack.c.bf16 %v48_v5, %v48_v5  ;;  %483 = vmatpush3.bf16.msra.mxu1 %v533_v7  ;;  %v536_v10 = vld [vmem:[%s744_s2 + $0x20] sm:$0xff]   ;;  %v537_v11 = vld [vmem:[%s744_s2 + $0x18] sm:$0xff]   ;;  %v538_v12 = vld [vmem:[%s744_s2 + $0x10] sm:$0xff]  }
  0x20   :  { %472 = vmatprep.subr.bf16.mxu0 %v623_v0  ;;  %484 = vmatprep.subr.bf16.mxu1 %v623_v0  ;;  %v539_v13 = vld [vmem:[%s744_s2 + $0x8] sm:$0xff]   ;;  %v540_v14 = vld [vmem:[%s744_s2] sm:$0xff]   ;;  %v149_v39 = vsub.s32 0, %v148_v37  ;;  %v541_v48 = vld [vmem:[%s745_s3 + $0x38] sm:$0xff]  }
  0x21   :  { %v126_v38 = vld [vmem:[#allocation5] sm:$0x1]  ;;  %v428_v43 = vld [vmem:[#allocation5 + $0x1] ss:$0 sm:$0xff]  ;;  %v542_v49 = vld [vmem:[%s745_s3 + $0x30] sm:$0xff]  }
  0x22   :  { %v543_v50 = vld [vmem:[%s745_s3 + $0x28] sm:$0xff]   ;;  %v544_v51 = vld [vmem:[%s745_s3 + $0x20] sm:$0xff]   ;;  %v545_v52 = vld [vmem:[%s745_s3 + $0x18] sm:$0xff]  }
  0x23   :  { %473 = vmatpush3.bf16.msra.mxu0 %v530_v2  ;;  %485 = vmatpush3.bf16.msra.mxu1 %v534_v8  ;;  %v546_v53 = vld [vmem:[%s745_s3 + $0x10] sm:$0xff]   ;;  %v547_v54 = vld [vmem:[%s745_s3 + $0x8] sm:$0xff]   ;;  %v548_v55 = vld [vmem:[%s745_s3] sm:$0xff]   ;;  %s625_s3 = smov [#allocation7]  }
  0x24   :  { %474 = vmatprep.subr.bf16.mxu0 %v623_v0  ;;  %486 = vmatprep.subr.bf16.mxu1 %v623_v0  ;;  %s413_s0 = sshll.u32 %s625_s3, 4  ;;  %s414_s0 = int_to_ptr.vmem [resolvable:$true] %s413_s0 }
  0x25   :  { %s593_s8 = scalar_lea.vmem %s414_s0, 128  ;;  %p598_p11 = scmp.lt.s32.totalorder %s414_s0, %s414_s0 }
  0x26   :  { %p594_p10 = scmp.ne.s32.totalorder %s414_s0, %s593_s8  ;;  %p599_p12 = scmp.lt.s32.totalorder %s593_s8, %s593_s8 }
  0x27   :  { %475 = vmatpush3.bf16.msra.mxu0 %v531_v3  ;;  %487 = vmatpush3.bf16.msra.mxu1 %v535_v9 }
  0x28   :  { %476 = vmatprep.subr.bf16.mxu0 %v623_v0  ;;  %488 = vmatprep.subr.bf16.mxu1 %v623_v0  ;;  %p600_p13 = por %p599_p12, %p598_p11 }
  0x2a   :  { %p601_p0 = pnand %p600_p13, %p594_p10 }
  0x2b   :  { %477 = vmatpush3.bf16.msra.mxu0 %v532_v4  ;;  %489 = vmatpush3.bf16.msra.mxu1 %v536_v10 }
  0x2c   :  { %502 = vmatprep.subr.bf16.mxu0 %v623_v0  ;;  %490 = vmatprep.subr.bf16.mxu1 %v623_v0 }
  0x2e   :  { %479 = vmatmul.mubr.msk.bf16.vlgmr.msra.gmra.mxu0 %vm82_vm1, %v49_v6 }
  0x2f   :  { %518 = vmatprep.mubr.msk.bf16.mxu0 %vm624_vm0, %v623_v0  ;;  %491 = vmatpush3.bf16.msra.mxu1 %v537_v11 }
  0x30   :  { %492 = vmatprep.subr.bf16.mxu1 %v623_v0  ;;  %503 = vmatpush3.bf16.msra.mxu0 %v541_v48 }
  0x31   :  { %504 = vmatprep.subr.bf16.mxu0 %v623_v0 }
  0x33   :  { %493 = vmatpush3.bf16.msra.mxu1 %v538_v12 }
  0x34   :  { %494 = vmatprep.subr.bf16.mxu1 %v623_v0  ;;  %505 = vmatpush3.bf16.msra.mxu0 %v542_v49 }
  0x35   :  { %506 = vmatprep.subr.bf16.mxu0 %v623_v0 }
  0x37   :  { %495 = vmatpush3.bf16.msra.mxu1 %v539_v13  ;;  %v263_v13 = vld [vmem:[#allocation5 + $0x2] sm:$0x1] }
  0x38   :  { %496 = vmatprep.subr.bf16.mxu1 %v623_v0  ;;  %507 = vmatpush3.bf16.msra.mxu0 %v543_v50 }
  0x39   :  { %508 = vmatprep.subr.bf16.mxu0 %v623_v0 }
  0x3b   :  { %497 = vmatpush3.bf16.msra.mxu1 %v540_v14 }
  0x3c   :  { %509 = vmatpush3.bf16.msra.mxu0 %v544_v51 }
  0x3d   :  { %510 = vmatprep.subr.bf16.mxu0 %v623_v0 }
  0x40   :  { %511 = vmatpush3.bf16.msra.mxu0 %v545_v52 }
  0x41   :  { %512 = vmatprep.subr.bf16.mxu0 %v623_v0 }
  0x44   :  { %513 = vmatpush3.bf16.msra.mxu0 %v546_v53 }
  0x45   :  { %514 = vmatprep.subr.bf16.mxu0 %v623_v0 }
  0x48   :  { %515 = vmatpush3.bf16.msra.mxu0 %v547_v54 }
  0x49   :  { %516 = vmatprep.subr.bf16.mxu0 %v623_v0 }
  0x4c   :  { %517 = vmatpush3.bf16.msra.mxu0 %v548_v55 }
  0xee   :  { %v120_v15 = vpop.f32.mrf.mxu0 }
  0xef   :  { %v128_v16 = vrot.slane %v120_v15, 4 }
  0xf0   :  { %v480_v17 = vpop.f32.mrf.mxu0 }
  0xf1   :  { %v129_v18 = vadd.f32 %v128_v16, %v120_v15  ;;  %v437_v17 = vld [vmem:[#allocation5 + $0x3] ss:$0 sm:$0xff] }
  0xf2   :  { %v123_v19 = vpop.f32.mrf.mxu0 }
  0xf3   :  { %v130_v20 = vrot.slane %v129_v18, 2 }
  0xf4   :  { %v481_v21 = vpop.f32.mrf.mxu0 }
  0xf5   :  { %v131_v22 = vadd.f32 %v130_v20, %v129_v18 }
  0xf7   :  { %v132_v23 = vrot.slane %v131_v22, 1 }
  0xf9   :  { %v133_v24 = vadd.f32 %v132_v23, %v131_v22  ;;  %v438_v22 = vld [vmem:[#allocation5 + $0x4] ss:$0 sm:$0xff] }
  0xfb   :  { %v134_v25 = vmul.f32 0.125, %v133_v24 }
  0xfd   :  { %v135_v26 = vsub.f32 %v120_v15, %v134_v25 }
  0xff   :  { %v136_v27 = vmul.f32 %v135_v26, %v135_v26 }
 0x101   :  { %v137_v28 = vrot.slane %v136_v27, 4 }
 0x103   :  { %v138_v29 = vadd.f32 %v137_v28, %v136_v27 }
 0x105   :  { %v139_v30 = vrot.slane %v138_v29, 2 }
 0x107   :  { %v140_v31 = vadd.f32 %v139_v30, %v138_v29 }
 0x109   :  { %v141_v32 = vrot.slane %v140_v31, 1 }
 0x10b   :  { %v142_v33 = vadd.f32 %v141_v32, %v140_v31 }
 0x10d   :  { %v143_v34 = vmul.f32 0.125, %v142_v33 }
 0x10f   :  { %v144_v35 = vadd.f32 1e-05, %v143_v34 }
 0x111   :  { %549 = vrsqrt.f32 %v144_v35 }
 0x11e   :  { %v550_v40 = vpop.eup %549 }
 0x11f   :  { %v146_v41 = vmul.f32 %v550_v40, %v126_v38 }
 0x121   :  { %v150_v42 = vrot.slane %v146_v41, %v149_v39 }
 0x123   :  { %v151_v44 = vmul.f32 %v150_v42, %v135_v26 }
 0x125   :  { %v156_v45 = vadd.f32 %v428_v43, %v151_v44 }
 0x127   :  { %v157_v46 = vmax.f32 %v156_v45, 0.0 }
 0x129   :  { %v158_v47 = vpack.c.bf16 %v157_v46, %v157_v46 }
 0x12b   :  { %499 = vmatmul.mubr.bf16.vlgmr.msra.gmra.mxu1 %v158_v47 }
 0x1eb   :  { %v257_v56 = vpop.f32.mrf.mxu1 }
 0x1ec   :  { %v265_v57 = vrot.slane %v257_v56, 4 }
 0x1ed   :  { %v500_v58 = vpop.f32.mrf.mxu1 }
 0x1ee   :  { %v266_v59 = vadd.f32 %v265_v57, %v257_v56 }
 0x1ef   :  { %v260_v60 = vpop.f32.mrf.mxu1 }
 0x1f0   :  { %v267_v61 = vrot.slane %v266_v59, 2 }
 0x1f1   :  { %v501_v62 = vpop.f32.mrf.mxu1 }
 0x1f2   :  { %v268_v63 = vadd.f32 %v267_v61, %v266_v59 }
 0x1f4   :  { %v269_v1 = vrot.slane %v268_v63, 1 }
 0x1f6   :  { %v270_v2 = vadd.f32 %v269_v1, %v268_v63 }
 0x1f8   :  { %v271_v3 = vmul.f32 0.125, %v270_v2 }
 0x1fa   :  { %v272_v4 = vsub.f32 %v257_v56, %v271_v3 }
 0x1fc   :  { %v273_v5 = vmul.f32 %v272_v4, %v272_v4 }
 0x1fe   :  { %v274_v6 = vrot.slane %v273_v5, 4 }
 0x200   :  { %v275_v0 = vadd.f32 %v274_v6, %v273_v5 }
 0x202   :  { %v276_v7 = vrot.slane %v275_v0, 2 }
 0x204   :  { %v277_v8 = vadd.f32 %v276_v7, %v275_v0 }
 0x206   :  { %v278_v9 = vrot.slane %v277_v8, 1 }
 0x208   :  { %v279_v10 = vadd.f32 %v278_v9, %v277_v8 }
 0x20a   :  { %v280_v11 = vmul.f32 0.125, %v279_v10 }
 0x20c   :  { %v281_v12 = vadd.f32 1e-05, %v280_v11 }
 0x20e   :  { %551 = vrsqrt.f32 %v281_v12 }
 0x21b   :  { %v552_v14 = vpop.eup %551 }
 0x21c   :  { %v283_v15 = vmul.f32 %v552_v14, %v263_v13 }
 0x21e   :  { %v287_v16 = vrot.slane %v283_v15, %v149_v39 }
 0x220   :  { %v288_v18 = vmul.f32 %v287_v16, %v272_v4 }
 0x222   :  { %v293_v19 = vadd.f32 %v437_v17, %v288_v18 }
 0x224   :  { %v294_v20 = vmax.f32 %v293_v19, 0.0 }
 0x226   :  { %v296_v21 = vpack.c.bf16 %v294_v20, %v294_v20 }
 0x228   :  { %519 = vmatmul.mubr.bf16.vlgmr.msra.gmra.mxu0 %v296_v21 }
 0x2e8   :  { %v399_v23 = vpop.f32.mrf.mxu0 }
 0x2e9   :  { %v400_v24 = vadd.f32 %v438_v22, %v399_v23 }
 0x2ea   :  { %v520_v25 = vpop.f32.mrf.mxu0 }
 0x2eb   :  { %406 = vst.msk [vmem:[#allocation7] sm:$0xff] %vm405_vm2, %v400_v24 }
 0x2ec   :  { %v402_v26 = vpop.f32.mrf.mxu0 }
 0x2ed   :  { %604 = shalt.err (!%p601_p0)
}
 0x2ee   :  { %416 = dma.vmem_to_hbm [thread:$0]  %s414_s0, 128, %s747_s5, [#allocation4]   ;;  %v521_v27 = vpop.f32.mrf.mxu0 }
 0x2ef   :  { %617 = dma.done.wait [#allocation4], 128  }
 0x2f0   :  { %618 = vsyncadd [#allocation4], 4294967168 }
 0x2f1   :  { %420 = vsyncpa [#allocation3], 1 }
 0x2f2   :  { %421 = vsyncpa [#allocation6], 1 }
 0x2f3   :  { %422 = vsyncpa [#allocation4], 1 }

</bundles_post_ra>
